<compile_context>
chip_gen: v6e
topology: v6e:2x2x1
jax: 0.10.0
libtpu: 0.0.40
codegen_flags: <defaults>
</compile_context>

<pallas_src>
import jax
import jax.numpy as jnp
from jax.experimental import pallas as pl
from jax.experimental.pallas import tpu as pltpu

LANES = 128
MAX_BLOCK_ROWS = 1024  # 1024 x 128 f32 = 512 KiB per input block per grid step


def _cmse_kernel(or_ref, oi_ref, tr_ref, ti_ref, acc_ref):
    # acc_ref is the resident (block_rows, LANES) output block for the current
    # split (parallel axis); it stays in VMEM across the reduction axis.
    @pl.when(pl.program_id(1) == 0)
    def _():
        acc_ref[...] = jnp.zeros_like(acc_ref)

    dr = or_ref[...] - tr_ref[...]
    di = oi_ref[...] - ti_ref[...]
    # Pure VPU elementwise accumulation; the expensive cross-lane/sublane
    # reduction happens exactly once, outside the kernel.
    acc_ref[...] += dr * dr + di * di


def cmse_loss(output, target):
    """Complex MSE loss: mse(real) + mse(imag), mean reduction (PyTorch default)."""
    assert output.shape == target.shape
    n_c = int(output.size)  # complex element count (the MSE divisor)

    # Deinterleave complex -> float32 planes (one XLA fusion per plane).
    # TODO(synk): complex64 -> float32 bitcast is unsupported by
    # lax.bitcast_convert_type, so this deinterleave can't be folded into the kernel.
    o_re = jnp.real(output).astype(jnp.float32).reshape(-1)
    o_im = jnp.imag(output).astype(jnp.float32).reshape(-1)
    t_re = jnp.real(target).astype(jnp.float32).reshape(-1)
    t_im = jnp.imag(target).astype(jnp.float32).reshape(-1)

    rows_total = n_c // LANES
    block_rows = min(MAX_BLOCK_ROWS, (rows_total // 8) * 8)

    if block_rows == 0:
        # Input smaller than one (8,128) tile: reduce entirely in plain JAX.
        dr = o_re - t_re
        di = o_im - t_im
        return (jnp.sum(dr * dr) + jnp.sum(di * di)) / n_c

    n_blocks = rows_total // block_rows
    n_splits = 2 if n_blocks >= 2 else 1          # megacore-friendly split (v7x)
    blocks_per_split = n_blocks // n_splits
    main_rows = n_splits * blocks_per_split * block_rows
    main = main_rows * LANES                       # elements handled by the kernel

    def slab(v):
        return v[:main].reshape(main_rows, LANES)

    in_spec = pl.BlockSpec((block_rows, LANES),
                           lambda s, i: (s * blocks_per_split + i, 0))
    out_spec = pl.BlockSpec((block_rows, LANES), lambda s, i: (s, 0))

    partials = pl.pallas_call(
        _cmse_kernel,
        out_shape=jax.ShapeDtypeStruct((n_splits * block_rows, LANES), jnp.float32),
        grid_spec=pltpu.PrefetchScalarGridSpec(
            num_scalar_prefetch=0,
            grid=(n_splits, blocks_per_split),
            in_specs=[in_spec, in_spec, in_spec, in_spec],
            out_specs=out_spec,
        ),
        compiler_params=pltpu.CompilerParams(
            dimension_semantics=("parallel", "arbitrary"),
        ),
    )(slab(o_re), slab(o_im), slab(t_re), slab(t_im))

    total = jnp.sum(partials)

    # Unaligned tail (< one block per plane): reduce in plain JAX instead of
    # materializing padded copies of every operand.
    if main < n_c:
        dr = o_re[main:] - t_re[main:]
        di = o_im[main:] - t_im[main:]
        total = total + jnp.sum(dr * dr) + jnp.sum(di * di)

    return total / n_c


if __name__ == "__main__":
    key = jax.random.PRNGKey(0)
    k1, k2, k3, k4 = jax.random.split(key, 4)

    shape = (2, 4, 16, 16)  # small NCHW-like complex tensors
    output = (jax.random.normal(k1, shape, dtype=jnp.float32)
              + 1j * jax.random.normal(k2, shape, dtype=jnp.float32)).astype(jnp.complex64)
    target = (jax.random.normal(k3, shape, dtype=jnp.float32)
              + 1j * jax.random.normal(k4, shape, dtype=jnp.float32)).astype(jnp.complex64)

    loss = cmse_loss(output, target)
    jax.block_until_ready(loss)

    # Pure-JAX reference check.
    ref = (jnp.mean((jnp.real(output) - jnp.real(target)) ** 2)
           + jnp.mean((jnp.imag(output) - jnp.imag(target)) ** 2))
    assert jnp.allclose(loss, ref, rtol=1e-5, atol=1e-6), (loss, ref)

    print("KERNEL_OK")
</pallas_src>

<mosaic_0001>
module attributes {stable_mosaic.version = 11 : i64} {
  func.func @_cmse_kernel(%arg0: i32, %arg1: i32, %arg2: memref<16x128xf32, #tpu.memory_space<vmem>>, %arg3: memref<16x128xf32, #tpu.memory_space<vmem>>, %arg4: memref<16x128xf32, #tpu.memory_space<vmem>>, %arg5: memref<16x128xf32, #tpu.memory_space<vmem>>, %arg6: memref<16x128xf32, #tpu.memory_space<vmem>>) attributes {dimension_semantics = [#tpu.dimension_semantics<parallel>, #tpu.dimension_semantics<arbitrary>], iteration_bounds = array<i64: 1, 1>, scalar_prefetch = 0 : i64, scratch_operands = 0 : i64, tpu.core_type = #tpu.core_type<tc>, window_params = [{transform_indices = @transform_0, window_bounds = array<i64: 16, 128>}, {transform_indices = @transform_1, window_bounds = array<i64: 16, 128>}, {transform_indices = @transform_2, window_bounds = array<i64: 16, 128>}, {transform_indices = @transform_3, window_bounds = array<i64: 16, 128>}, {transform_indices = @transform_4, window_bounds = array<i64: 16, 128>}]} {
    %c0_i32 = arith.constant 0 : i32
    %0 = arith.cmpi eq, %arg1, %c0_i32 : i32
    %1 = arith.extui %0 : i1 to i32
    %c0_i32_0 = arith.constant 0 : i32
    %2 = arith.cmpi ne, %1, %c0_i32_0 : i32
    scf.if %2 {
      %cst = arith.constant 0.000000e+00 : f32
      %15 = vector.broadcast %cst : f32 to vector<16x128xf32>
      %c0_12 = arith.constant 0 : index
      %c0_13 = arith.constant 0 : index
      %16 = vector.load %arg6[%c0_12, %c0_13] : memref<16x128xf32, #tpu.memory_space<vmem>>, vector<16x128xf32>
      tpu.vector_store %arg6[%c0_12, %c0_13], %15 {strides = array<i32>} : memref<16x128xf32, #tpu.memory_space<vmem>>, vector<16x128xf32>,
    } else {
    }
    %c0 = arith.constant 0 : index
    %c0_1 = arith.constant 0 : index
    %3 = vector.load %arg2[%c0, %c0_1] : memref<16x128xf32, #tpu.memory_space<vmem>>, vector<16x128xf32>
    %c0_2 = arith.constant 0 : index
    %c0_3 = arith.constant 0 : index
    %4 = vector.load %arg4[%c0_2, %c0_3] : memref<16x128xf32, #tpu.memory_space<vmem>>, vector<16x128xf32>
    %5 = arith.subf %3, %4 : vector<16x128xf32>
    %c0_4 = arith.constant 0 : index
    %c0_5 = arith.constant 0 : index
    %6 = vector.load %arg3[%c0_4, %c0_5] : memref<16x128xf32, #tpu.memory_space<vmem>>, vector<16x128xf32>
    %c0_6 = arith.constant 0 : index
    %c0_7 = arith.constant 0 : index
    %7 = vector.load %arg5[%c0_6, %c0_7] : memref<16x128xf32, #tpu.memory_space<vmem>>, vector<16x128xf32>
    %8 = arith.subf %6, %7 : vector<16x128xf32>
    %c0_8 = arith.constant 0 : index
    %c0_9 = arith.constant 0 : index
    %9 = vector.load %arg6[%c0_8, %c0_9] : memref<16x128xf32, #tpu.memory_space<vmem>>, vector<16x128xf32>
    %10 = arith.mulf %5, %5 : vector<16x128xf32>
    %11 = arith.mulf %8, %8 : vector<16x128xf32>
    %12 = arith.addf %10, %11 : vector<16x128xf32>
    %13 = arith.addf %9, %12 : vector<16x128xf32>
    %c0_10 = arith.constant 0 : index
    %c0_11 = arith.constant 0 : index
    %14 = vector.load %arg6[%c0_10, %c0_11] : memref<16x128xf32, #tpu.memory_space<vmem>>, vector<16x128xf32>
    tpu.vector_store %arg6[%c0_10, %c0_11], %13 {strides = array<i32>} : memref<16x128xf32, #tpu.memory_space<vmem>>, vector<16x128xf32>,
    return
  }
  func.func @transform_0(%arg0: i32, %arg1: i32) -> (i32, i32) {
    %c1_i32 = arith.constant 1 : i32
    %0 = arith.muli %arg0, %c1_i32 : i32
    %1 = arith.addi %0, %arg1 : i32
    %c0_i32 = arith.constant 0 : i32
    %c0_i32_0 = arith.constant 0 : i32
    return %1, %c0_i32 : i32, i32
  }
  func.func @transform_1(%arg0: i32, %arg1: i32) -> (i32, i32) {
    %c1_i32 = arith.constant 1 : i32
    %0 = arith.muli %arg0, %c1_i32 : i32
    %1 = arith.addi %0, %arg1 : i32
    %c0_i32 = arith.constant 0 : i32
    %c0_i32_0 = arith.constant 0 : i32
    return %1, %c0_i32 : i32, i32
  }
  func.func @transform_2(%arg0: i32, %arg1: i32) -> (i32, i32) {
    %c1_i32 = arith.constant 1 : i32
    %0 = arith.muli %arg0, %c1_i32 : i32
    %1 = arith.addi %0, %arg1 : i32
    %c0_i32 = arith.constant 0 : i32
    %c0_i32_0 = arith.constant 0 : i32
    return %1, %c0_i32 : i32, i32
  }
  func.func @transform_3(%arg0: i32, %arg1: i32) -> (i32, i32) {
    %c1_i32 = arith.constant 1 : i32
    %0 = arith.muli %arg0, %c1_i32 : i32
    %1 = arith.addi %0, %arg1 : i32
    %c0_i32 = arith.constant 0 : i32
    %c0_i32_0 = arith.constant 0 : i32
    return %1, %c0_i32 : i32, i32
  }
  func.func @transform_4(%arg0: i32, %arg1: i32) -> (i32, i32) {
    %c0_i32 = arith.constant 0 : i32
    %c0_i32_0 = arith.constant 0 : i32
    return %arg0, %c0_i32 : i32, i32
  }
}

</mosaic_0001>

<bundles_post_ra>
// kernel: tpu_custom_call.1
= control target key start
LH: loop header
LB: loop body
LE: loop exit
PB: predicated region body
PF: predicated region fallthrough
CT: control target
= control target key end

     0   :  { %9 = vsyncpa [#allocation3], 0  ;;  %s324_s0 = inlined_call_operand.hbm [shape: f32[16,128], index: 0, kind: input, shape index: {}]   ;;  %s325_s1 = inlined_call_operand.hbm [shape: f32[16,128], index: 1, kind: input, shape index: {}]   ;;  %s326_s2 = inlined_call_operand.hbm [shape: f32[16,128], index: 2, kind: input, shape index: {}]   ;;  %s327_s3 = inlined_call_operand.hbm [shape: f32[16,128], index: 3, kind: input, shape index: {}]   ;;  %s328_s4 = inlined_call_operand.hbm [shape: f32[16,128], index: 4, kind: output, shape index: {}]  }
   0x1   :  { %10 = vsyncpa [#allocation6], 0 }
   0x2   :  { %11 = vsyncpa [#allocation9], 0 }
   0x3   :  { %12 = vsyncpa [#allocation4], 0  ;;  %s262_s15 = smov [#allocation5]   ;;  %s263_s17 = smov [#allocation2]  }
   0x4   :  { %s38_s16 = sshll.u32 %s262_s15, 4  ;;  %s22_s18 = sshll.u32 %s263_s17, 4  ;;  %s39_s16 = int_to_ptr.vmem [resolvable:$true] %s38_s16  ;;  %s23_s18 = int_to_ptr.vmem [resolvable:$true] %s22_s18 }
   0x5   :  { %s162_s19 = scalar_lea.vmem %s39_s16, 256  ;;  %p167_p1 = scmp.lt.s32.totalorder %s39_s16, %s39_s16 }
   0x6   :  { %p163_p0 = scmp.ne.s32.totalorder %s39_s16, %s162_s19  ;;  %p168_p2 = scmp.lt.s32.totalorder %s162_s19, %s162_s19 }
   0x8   :  { %p169_p3 = por %p168_p2, %p167_p1 }
   0xa   :  { %p170_p4 = pnand %p169_p3, %p163_p0 }
   0xc   :  { %173 = shalt.err (!%p170_p4)
}
   0xd   :  { %s264_s20 = smov 128   ;;  %s265_s21 = smov 8  }
   0xe   :  { %44 = dma.hbm_to_vmem [thread:$0]  %s325_s1, 256, %s39_s16, [#allocation6], %s264_s20, %s264_s20, %s265_s21  }
   0xf   :  { %s182_s24 = scalar_lea.vmem %s23_s18, 256  ;;  %p187_p6 = scmp.lt.s32.totalorder %s23_s18, %s23_s18 }
  0x10   :  { %p183_p5 = scmp.ne.s32.totalorder %s23_s18, %s182_s24  ;;  %p188_p7 = scmp.lt.s32.totalorder %s182_s24, %s182_s24 }
  0x12   :  { %p189_p8 = por %p188_p7, %p187_p6 }
  0x14   :  { %p190_p9 = pnand %p189_p8, %p183_p5 }
  0x16   :  { %193 = shalt.err (!%p190_p9)
}
  0x17   :  { %28 = dma.hbm_to_vmem [thread:$0]  %s324_s0, 256, %s23_s18, [#allocation3], %s264_s20, %s264_s20, %s265_s21  }
  0x18   :  { %s266_s27 = smov [#allocation7]   ;;  %s267_s29 = smov [#allocation8]  }
  0x19   :  { %s54_s28 = sshll.u32 %s266_s27, 4  ;;  %s70_s30 = sshll.u32 %s267_s29, 4  ;;  %s55_s28 = int_to_ptr.vmem [resolvable:$true] %s54_s28  ;;  %s71_s30 = int_to_ptr.vmem [resolvable:$true] %s70_s30 }
  0x1a   :  { %s202_s1 = scalar_lea.vmem %s55_s28, 256  ;;  %p207_p11 = scmp.lt.s32.totalorder %s55_s28, %s55_s28 }
  0x1b   :  { %p203_p10 = scmp.ne.s32.totalorder %s55_s28, %s202_s1  ;;  %p208_p12 = scmp.lt.s32.totalorder %s202_s1, %s202_s1 }
  0x1d   :  { %p209_p13 = por %p208_p12, %p207_p11 }
  0x1f   :  { %p210_p0 = pnand %p209_p13, %p203_p10 }
  0x21   :  { %213 = shalt.err (!%p210_p0)
}
  0x22   :  { %60 = dma.hbm_to_vmem [thread:$0]  %s326_s2, 256, %s55_s28, [#allocation6], %s264_s20, %s264_s20, %s265_s21  }
  0x23   :  { %s222_s0 = scalar_lea.vmem %s71_s30, 256  ;;  %p227_p2 = scmp.lt.s32.totalorder %s71_s30, %s71_s30 }
  0x24   :  { %p223_p1 = scmp.ne.s32.totalorder %s71_s30, %s222_s0  ;;  %p228_p3 = scmp.lt.s32.totalorder %s222_s0, %s222_s0 }
  0x26   :  { %p229_p4 = por %p228_p3, %p227_p2 }
  0x28   :  { %p230_p5 = pnand %p229_p4, %p223_p1 }
  0x2a   :  { %233 = shalt.err (!%p230_p5)
}
  0x2b   :  { %76 = dma.hbm_to_vmem [thread:$0]  %s327_s3, 256, %s71_s30, [#allocation9], %s264_s20, %s264_s20, %s265_s21  }
  0x2c   :  { %254 = dma.done.wait [#allocation3], 256  }
  0x2d   :  { %255 = vsyncadd [#allocation3], 4294967040 }
  0x2e   :  { %256 = dma.done.wait [#allocation6], 512  }
  0x2f   :  { %257 = vsyncadd [#allocation6], 4294966784 }
  0x30   :  { %258 = dma.done.wait [#allocation9], 256  }
  0x31   :  { %259 = vsyncadd [#allocation9], 4294967040  ;;  %v103_v0 = vld [vmem:[#allocation2] sm:$0xff]  ;;  %v109_v2 = vld [vmem:[#allocation5] sm:$0xff]  ;;  %s268_s2 = smov [#allocation10]  }
  0x32   :  { %v105_v1 = vld [vmem:[#allocation7] sm:$0xff]  ;;  %v111_v4 = vld [vmem:[#allocation8] sm:$0xff]  ;;  %v104_v5 = vld [vmem:[#allocation2 + $0x8] sm:$0xff]  ;;  %s132_s3 = sshll.u32 %s268_s2, 4  ;;  %s133_s3 = int_to_ptr.vmem [resolvable:$true] %s132_s3 }
  0x33   :  { %v107_v3 = vsub.f32 %v103_v0, %v105_v1  ;;  %v106_v6 = vld [vmem:[#allocation7 + $0x8] sm:$0xff]  ;;  %v113_v7 = vsub.f32 %v109_v2, %v111_v4  ;;  %v110_v9 = vld [vmem:[#allocation5 + $0x8] sm:$0xff]  ;;  %s234_s9 = scalar_lea.vmem %s133_s3, 256  ;;  %p239_p7 = scmp.lt.s32.totalorder %s133_s3, %s133_s3 }
  0x34   :  { %v108_v8 = vsub.f32 %v104_v5, %v106_v6  ;;  %v112_v10 = vld [vmem:[#allocation8 + $0x8] sm:$0xff]  ;;  %p235_p6 = scmp.ne.s32.totalorder %s133_s3, %s234_s9  ;;  %p240_p8 = scmp.lt.s32.totalorder %s234_s9, %s234_s9 }
  0x35   :  { %v117_v11 = vmul.f32 %v107_v3, %v107_v3  ;;  %v114_v12 = vsub.f32 %v110_v9, %v112_v10  ;;  %v119_v13 = vmul.f32 %v113_v7, %v113_v7 }
  0x36   :  { %v118_v14 = vmul.f32 %v108_v8, %v108_v8  ;;  %p241_p9 = por %p240_p8, %p239_p7 }
  0x37   :  { %v120_v15 = vmul.f32 %v114_v12, %v114_v12  ;;  %v121_v16 = vadd.f32 %v119_v13, %v117_v11 }
  0x38   :  { %p242_p10 = pnand %p241_p9, %p235_p6 }
  0x39   :  { %v122_v17 = vadd.f32 %v120_v15, %v118_v14  ;;  %125 = vst [vmem:[#allocation10] sm:$0xff] %v121_v16 }
  0x3b   :  { %126 = vst [vmem:[#allocation10 + $0x8] sm:$0xff] %v122_v17 }
  0x3c   :  { %245 = shalt.err (!%p242_p10)
}
  0x3d   :  { %138 = dma.vmem_to_hbm [thread:$0]  %s133_s3, 256, %s328_s4, [#allocation4], %s264_s20, %s264_s20, %s265_s21  }
  0x3e   :  { %260 = dma.done.wait [#allocation4], 256  }
  0x3f   :  { %261 = vsyncadd [#allocation4], 4294967040 }
  0x40   :  { %142 = vsyncpa [#allocation3], 1 }
  0x41   :  { %143 = vsyncpa [#allocation6], 1 }
  0x42   :  { %144 = vsyncpa [#allocation9], 1 }
  0x43   :  { %145 = vsyncpa [#allocation4], 1 }

</bundles_post_ra>
